<compile_context>
chip_gen: v7x
topology: tpu7x:2x2x1
jax: 0.10.0
libtpu: 0.0.40
codegen_flags: <defaults>
</compile_context>

<pallas_src>
import functools

import jax
import jax.numpy as jnp
from jax.experimental import pallas as pl
from jax.experimental.pallas import tpu as pltpu

GAMMA = 2
IGNORE_INDEX = -1


def _focal_loss_kernel(x_ref, t_ref, out_ref, *, num_rows):
    # x_ref:  (TILE_N, C) logits in their native dtype (no padding anywhere)
    # t_ref:  (TILE_N, 1) int32 targets
    # out_ref:(8, 128) f32 partial block: [0,0] = -sum(w), [0,1] = valid count
    x = x_ref[...]                                    # native dtype (bf16 stays bf16)
    tn, c = x.shape

    # Per-row max and shift in the native dtype (bf16 VALU on v6e/v7x).
    m = jnp.max(x, axis=1, keepdims=True)             # (TN, 1)
    shifted = x - m                                   # (TN, C)

    # Softmax denominator: exp + accumulation in f32 (EUP slot, f32 accuracy).
    denom = jnp.sum(jnp.exp(shifted.astype(jnp.float32)),
                    axis=1, keepdims=True)            # (TN, 1)

    # Gather the target column via a one-hot compare against a (1, C) class
    # iota row (cheap to regenerate each step; no full-tile iota).
    t = t_ref[...]                                    # (TN, 1) int32
    cls = jax.lax.broadcasted_iota(jnp.int32, (1, c), 1)
    sel = cls == t                                    # (TN, C) via broadcast
    picked = jnp.sum(jnp.where(sel, shifted, jnp.zeros((), shifted.dtype)),
                     axis=1, keepdims=True).astype(jnp.float32)   # (TN, 1)

    # Focal weight computed only on the gathered (TN, 1) column.
    logpt_t = picked - jnp.log(denom)                 # (TN, 1) f32
    pt_t = jnp.exp(logpt_t)
    omp = 1.0 - pt_t
    w_t = (omp * omp) * logpt_t                       # gamma = 2

    # Validity: inside the real batch (the partial last block reads undefined
    # rows) AND not ignore_index.  Use a select, not a multiply, so garbage
    # NaN/Inf from the tail rows cannot survive.
    row = (pl.program_id(0) * tn
           + jax.lax.broadcasted_iota(jnp.int32, (tn, 1), 0))
    valid = jnp.logical_and(row < num_rows, t != IGNORE_INDEX)
    loss_tile = -jnp.sum(jnp.where(valid, w_t, 0.0), keepdims=True)      # (1, 1)
    count_tile = jnp.sum(valid.astype(jnp.float32), keepdims=True)       # (1, 1)

    # Lane-dense partial output: lane 0 = loss partial, lane 1 = count partial.
    col = jax.lax.broadcasted_iota(jnp.int32, (8, 128), 1)
    out_ref[...] = jnp.where(col == 0, loss_tile,
                             jnp.where(col == 1, count_tile, 0.0))


def _round_up(x, m):
    return ((x + m - 1) // m) * m


def _vmem_capacity_bytes():
    try:
        cap = getattr(pltpu.get_tpu_info(), "vmem_capacity_bytes", None)
        if cap:
            return int(cap)
    except Exception:
        pass
    return 64 * 1024 * 1024            # conservative fallback (v7x per-TC VMEM)


def focal_loss(logits, target):
    """logits: (N, C) float (f32 or bf16); target: (N,) int. Scalar f32 loss."""
    n, c = logits.shape
    itemsize = jnp.dtype(logits.dtype).itemsize

    # Generation-aware budget: v5e/v6e (128 MiB VMEM) -> 64 MiB limit,
    # v7x (64 MiB per TC) -> 48 MiB.  With dimension_semantics=("parallel",)
    # each TC double-buffers its own tiles, so budget per-TC.
    vmem_cap = _vmem_capacity_bytes()
    vmem_limit = min((3 * vmem_cap) // 4, 64 * 1024 * 1024)

    # Per-row VMEM footprint:
    #   2 x double-buffered native-dtype logits rows
    #   ~3 x full-tile f32 temporaries (upcast/exp/select)
    #   2 x lane-padded (x128) int32 target rows
    per_row = 2 * c * itemsize + 3 * c * 4 + 2 * 128 * 4
    budget = (vmem_limit * 4) // 5                     # 20% headroom for scratch
    tile_n = budget // per_row
    tile_n = max(8, min((tile_n // 8) * 8, 8192, _round_up(n, 8)))
    # TODO(synk): for vocab-scale C where even an 8-row tile overflows VMEM,
    # add a class-chunked (online max/sum) variant with the class axis on the grid.

    num_tiles = pl.cdiv(n, tile_n)
    t = target.reshape(n, 1).astype(jnp.int32)

    partials = pl.pallas_call(
        functools.partial(_focal_loss_kernel, num_rows=n),
        out_shape=jax.ShapeDtypeStruct((num_tiles, 8, 128), jnp.float32),
        grid_spec=pl.GridSpec(
            grid=(num_tiles,),
            in_specs=[
                # No wrapper-side padding: the class axis uses the full dim C,
                # the partial last row-block is masked inside the kernel.
                pl.BlockSpec((tile_n, c), lambda i: (i, 0)),
                pl.BlockSpec((tile_n, 1), lambda i: (i, 0)),
            ],
            out_specs=pl.BlockSpec((None, 8, 128), lambda i: (i, 0, 0)),
        ),
        compiler_params=pltpu.CompilerParams(
            dimension_semantics=("parallel",),         # megacore shards row tiles
            vmem_limit_bytes=int(vmem_limit),
        ),
    )(logits, t)

    loss_sum = jnp.sum(partials[:, 0, 0])
    count = jnp.sum(partials[:, 0, 1])
    # Note: if every target is IGNORE_INDEX, count == 0 -> NaN (matches PyTorch).
    return loss_sum / count


def focal_loss_ref(logits, target):
    """Pure-JAX reference mirroring the PyTorch module."""
    logpt = jax.nn.log_softmax(logits.astype(jnp.float32), axis=1)
    pt = jnp.exp(logpt)
    w = (1.0 - pt) ** GAMMA * logpt
    n = logits.shape[0]
    valid = target != IGNORE_INDEX
    safe_t = jnp.where(valid, target, 0)
    picked = w[jnp.arange(n), safe_t]
    loss_sum = -jnp.sum(jnp.where(valid, picked, 0.0))
    return loss_sum / jnp.sum(valid.astype(jnp.float32))


if __name__ == "__main__":
    key = jax.random.PRNGKey(0)
    k1, k2 = jax.random.split(key)

    N, C = 8, 32                                   # small synthetic shapes
    logits = jax.random.normal(k1, (N, C), dtype=jnp.float32)
    target = jax.random.randint(k2, (N,), 0, C, dtype=jnp.int32)
    # include an ignored sample to exercise ignore_index=-1
    target = target.at[3].set(IGNORE_INDEX)

    loss = focal_loss(logits, target)
    jax.block_until_ready(loss)

    ref = focal_loss_ref(logits, target)
    assert jnp.allclose(loss, ref, rtol=1e-5, atol=1e-5), (loss, ref)

    print("KERNEL_OK")
</pallas_src>

<mosaic_0001>
module attributes {stable_mosaic.version = 11 : i64} {
  func.func @_focal_loss_kernel(%arg0: i32, %arg1: memref<8x32xf32, #tpu.memory_space<vmem>>, %arg2: memref<8x1xi32, #tpu.memory_space<vmem>>, %arg3: memref<1x8x128xf32, #tpu.memory_space<vmem>>) attributes {dimension_semantics = [#tpu.dimension_semantics<parallel>], iteration_bounds = array<i64: 1>, scalar_prefetch = 0 : i64, scratch_operands = 0 : i64, tpu.core_type = #tpu.core_type<tc>, window_params = [{transform_indices = @transform_0, window_bounds = array<i64: 8, 32>}, {transform_indices = @transform_1, window_bounds = array<i64: 8, 1>}, {transform_indices = @transform_2, window_bounds = array<i64: 1, 8, 128>}]} {
    %c0 = arith.constant 0 : index
    %c0_0 = arith.constant 0 : index
    %0 = vector.load %arg1[%c0, %c0_0] : memref<8x32xf32, #tpu.memory_space<vmem>>, vector<8x32xf32>
    %cst = arith.constant dense<0xFF800000> : vector<8xf32>
    %1 = vector.multi_reduction <maximumf>, %0, %cst [1] : vector<8x32xf32> to vector<8xf32>
    %2 = vector.shape_cast %1 : vector<8xf32> to vector<8x1xf32>
    %3 = vector.broadcast %2 : vector<8x1xf32> to vector<8x32xf32>
    %4 = arith.subf %0, %3 : vector<8x32xf32>
    %5 = math.exp %4 : vector<8x32xf32>
    %cst_1 = arith.constant dense<0.000000e+00> : vector<8xf32>
    %6 = vector.multi_reduction <add>, %5, %cst_1 [1] : vector<8x32xf32> to vector<8xf32>
    %7 = vector.shape_cast %6 : vector<8xf32> to vector<8x1xf32>
    %c0_2 = arith.constant 0 : index
    %c0_3 = arith.constant 0 : index
    %8 = vector.load %arg2[%c0_2, %c0_3] : memref<8x1xi32, #tpu.memory_space<vmem>>, vector<8x1xi32>
    %9 = tpu.iota {dimensions = array<i32: 1>} : vector<1x32xi32>
    %10 = vector.broadcast %9 : vector<1x32xi32> to vector<8x32xi32>
    %11 = vector.broadcast %8 : vector<8x1xi32> to vector<8x32xi32>
    %12 = arith.cmpi eq, %10, %11 : vector<8x32xi32>
    %cst_4 = arith.constant 0.000000e+00 : f32
    %13 = vector.broadcast %cst_4 : f32 to vector<8x32xf32>
    %14 = arith.select %12, %4, %13 : vector<8x32xi1>, vector<8x32xf32>
    %cst_5 = arith.constant dense<0.000000e+00> : vector<8xf32>
    %15 = vector.multi_reduction <add>, %14, %cst_5 [1] : vector<8x32xf32> to vector<8xf32>
    %16 = vector.shape_cast %15 : vector<8xf32> to vector<8x1xf32>
    %17 = math.log %7 : vector<8x1xf32>
    %18 = arith.subf %16, %17 : vector<8x1xf32>
    %19 = math.exp %18 : vector<8x1xf32>
    %cst_6 = arith.constant 1.000000e+00 : f32
    %20 = vector.broadcast %cst_6 : f32 to vector<8x1xf32>
    %21 = arith.subf %20, %19 : vector<8x1xf32>
    %22 = arith.mulf %21, %21 : vector<8x1xf32>
    %23 = arith.mulf %22, %18 : vector<8x1xf32>
    %c8_i32 = arith.constant 8 : i32
    %24 = arith.muli %arg0, %c8_i32 : i32
    %25 = tpu.iota {dimensions = array<i32: 0>} : vector<8x1xi32>
    %26 = vector.broadcast %24 : i32 to vector<8x1xi32>
    %27 = arith.addi %26, %25 : vector<8x1xi32>
    %c8_i32_7 = arith.constant 8 : i32
    %28 = vector.broadcast %c8_i32_7 : i32 to vector<8x1xi32>
    %29 = arith.cmpi slt, %27, %28 : vector<8x1xi32>
    %c-1_i32 = arith.constant -1 : i32
    %30 = vector.broadcast %c-1_i32 : i32 to vector<8x1xi32>
    %31 = arith.cmpi ne, %8, %30 : vector<8x1xi32>
    %32 = arith.andi %29, %31 : vector<8x1xi1>
    %cst_8 = arith.constant 0.000000e+00 : f32
    %33 = vector.broadcast %cst_8 : f32 to vector<8x1xf32>
    %34 = arith.select %32, %23, %33 : vector<8x1xi1>, vector<8x1xf32>
    %35 = vector.shape_cast %34 : vector<8x1xf32> to vector<1x8x1xf32>
    %cst_9 = arith.constant dense<0.000000e+00> : vector<1xf32>
    %36 = vector.multi_reduction <add>, %35, %cst_9 [1, 2] : vector<1x8x1xf32> to vector<1xf32>
    %37 = vector.shape_cast %36 : vector<1xf32> to vector<1x1x1xf32>
    %38 = vector.extract %37[0, 0, 0] : f32 from vector<1x1x1xf32>
    %39 = vector.broadcast %38 : f32 to vector<1x1xf32>
    %cst_10 = arith.constant 0.000000e+00 : f32
    %40 = vector.broadcast %cst_10 : f32 to vector<1x1xf32>
    %41 = arith.subf %40, %39 : vector<1x1xf32>
    %42 = arith.extui %32 : vector<8x1xi1> to vector<8x1xi32>
    %43 = arith.sitofp %42 : vector<8x1xi32> to vector<8x1xf32>
    %44 = vector.shape_cast %43 : vector<8x1xf32> to vector<1x8x1xf32>
    %cst_11 = arith.constant dense<0.000000e+00> : vector<1xf32>
    %45 = vector.multi_reduction <add>, %44, %cst_11 [1, 2] : vector<1x8x1xf32> to vector<1xf32>
    %46 = vector.shape_cast %45 : vector<1xf32> to vector<1x1x1xf32>
    %47 = vector.extract %46[0, 0, 0] : f32 from vector<1x1x1xf32>
    %48 = vector.broadcast %47 : f32 to vector<1x1xf32>
    %49 = tpu.iota {dimensions = array<i32: 1>} : vector<8x128xi32>
    %c0_i32 = arith.constant 0 : i32
    %50 = vector.broadcast %c0_i32 : i32 to vector<8x128xi32>
    %51 = arith.cmpi eq, %49, %50 : vector<8x128xi32>
    %c1_i32 = arith.constant 1 : i32
    %52 = vector.broadcast %c1_i32 : i32 to vector<8x128xi32>
    %53 = arith.cmpi eq, %49, %52 : vector<8x128xi32>
    %cst_12 = arith.constant 0.000000e+00 : f32
    %54 = vector.shape_cast %48 : vector<1x1xf32> to vector<1x1xf32>
    %55 = vector.broadcast %54 : vector<1x1xf32> to vector<8x128xf32>
    %56 = vector.broadcast %cst_12 : f32 to vector<8x128xf32>
    %57 = arith.select %53, %55, %56 : vector<8x128xi1>, vector<8x128xf32>
    %58 = vector.shape_cast %41 : vector<1x1xf32> to vector<1x1xf32>
    %59 = vector.broadcast %58 : vector<1x1xf32> to vector<8x128xf32>
    %60 = arith.select %51, %59, %57 : vector<8x128xi1>, vector<8x128xf32>
    %c0_13 = arith.constant 0 : index
    %c0_14 = arith.constant 0 : index
    %c0_15 = arith.constant 0 : index
    %61 = vector.load %arg3[%c0_13, %c0_14, %c0_15] : memref<1x8x128xf32, #tpu.memory_space<vmem>>, vector<1x8x128xf32>
    %62 = vector.shape_cast %61 : vector<1x8x128xf32> to vector<8x128xf32>
    %63 = vector.shape_cast %60 : vector<8x128xf32> to vector<1x8x128xf32>
    tpu.vector_store %arg3[%c0_13, %c0_14, %c0_15], %63 {strides = array<i32>} : memref<1x8x128xf32, #tpu.memory_space<vmem>>, vector<1x8x128xf32>,
    return
  }
  func.func @transform_0(%arg0: i32) -> (i32, i32) {
    %c0_i32 = arith.constant 0 : i32
    %c0_i32_0 = arith.constant 0 : i32
    return %arg0, %c0_i32 : i32, i32
  }
  func.func @transform_1(%arg0: i32) -> (i32, i32) {
    %c0_i32 = arith.constant 0 : i32
    %c0_i32_0 = arith.constant 0 : i32
    return %arg0, %c0_i32 : i32, i32
  }
  func.func @transform_2(%arg0: i32) -> (i32, i32, i32) {
    %c0_i32 = arith.constant 0 : i32
    %c0_i32_0 = arith.constant 0 : i32
    %c0_i32_1 = arith.constant 0 : i32
    return %arg0, %c0_i32, %c0_i32_0 : i32, i32, i32
  }
}

</mosaic_0001>

<bundles_post_ra>
// kernel: tpu_custom_call.1
= control target key start
LH: loop header
LB: loop body
LE: loop exit
PB: predicated region body
PF: predicated region fallthrough
CT: control target
= control target key end

     0   :  { %vm13_vm0 = vcmask 261120   ;;  %s174_s0 = inlined_call_operand.vmem [shape: f32[8,32], index: 0, kind: input, shape index: {}]   ;;  %s175_s1 = inlined_call_operand.vmem [shape: s32[8,1], index: 1, kind: input, shape index: {}]   ;;  %s176_s2 = inlined_call_operand.hbm [shape: f32[1,8,128], index: 2, kind: output, shape index: {}]  }
   0x1   :  { %v12_v0 = vld [vmem:[%s174_s0] sm:$0xff] }
   0x2   :  { %7 = vsyncpa [#allocation3], 0  ;;  %v14_v1 = vsel %vm13_vm0, %v12_v0, -inf  ;;  %v135_v2 = vmov 0   ;;  %v23_v3 = vld [vmem:[%s175_s1] sm:$0xff]  ;;  %v24_v7 = vlaneseq  ;;  %vm51_vm3 = vcmask 7168  }
   0x3   :  { %104 = vset.pattern.permute.xlu0 %v135_v2  ;;  %vm48_vm2 = vcmp.ne.s32.totalorder %v23_v3, 4294967295  ;;  %v136_v25 = vmov 0.0   ;;  %s137_s1 = smov [#allocation2]  }
   0x4   :  { %15 = vmax.xlane.f32.xlu0 %v14_v1  ;;  %v25_v8 = vand.u32 127, %v24_v7  ;;  %v96_v26 = vsel %vm48_vm2, 1.0, %v136_v25  ;;  %s88_s13 = sshll.u32 %s137_s1, 4  ;;  %s89_s13 = int_to_ptr.vmem [resolvable:$true] %s88_s13 }
   0x5   :  { %v66_v28 = vsel %vm51_vm3, %v96_v26, 0.0  ;;  %s111_s15 = scalar_lea.vmem %s89_s13, 128  ;;  %p116_p1 = scmp.lt.s32.totalorder %s89_s13, %s89_s13 }
   0x6   :  { %vm77_vm4 = vcmp.eq.s32.totalorder %v25_v8, 1  ;;  %vm76_vm5 = vcmp.eq.s32.totalorder %v25_v8, 0  ;;  %p112_p0 = scmp.ne.s32.totalorder %s89_s13, %s111_s15  ;;  %p117_p2 = scmp.lt.s32.totalorder %s111_s15, %s111_s15 }
   0x8   :  { %p118_p3 = por %p117_p2, %p116_p1 }
   0xa   :  { %p119_p4 = pnand %p118_p3, %p112_p0 }
  0x1a   :  { %27 = vperm.xlu0 %104, %v23_v3  }
  0x91   :  { %v16_v4 = vpop.xlane.xlu0 %15 }
  0x92   :  { %v17_v5 = vsub.f32 %v12_v0, %v16_v4 }
  0x94   :  { %v18_v6 = vmul.f32 1.442695, %v17_v5 }
  0x96   :  { %105 = vpow2.f32 %v18_v6 }
  0x99   :  { %v28_v9 = vpop.permute.xlu0 %27 }
  0x9a   :  { %vm29_vm1 = vcmp.eq.s32.totalorder %v25_v8, %v28_v9 }
  0x9b   :  { %v30_v12 = vsel %vm29_vm1, %v17_v5, 0.0 }
  0x9c   :  { %v31_v13 = vsel %vm13_vm0, %v30_v12, 0.0 }
  0xa0   :  { %v106_v10 = vpop.eup %105 }
  0xa1   :  { %v20_v11 = vsel %vm13_vm0, %v106_v10, 0.0 }
  0xa2   :  { %21 = vadd.xlane.f32.xlu1 %v20_v11 }
  0xa6   :  { %32 = vadd.xlane.f32.xlu1 %v31_v13 }
 0x12f   :  { %v22_v14 = vpop.xlane.xlu1 %21 }
 0x130   :  { %107 = vlog2.f32 %v22_v14 }
 0x133   :  { %v33_v17 = vpop.xlane.xlu1 %32 }
 0x13a   :  { %v108_v15 = vpop.eup %107 }
 0x13b   :  { %v35_v16 = vmul.f32 0.6931472, %v108_v15 }
 0x13d   :  { %v36_v18 = vsub.f32 %v33_v17, %v35_v16 }
 0x13f   :  { %v37_v19 = vmul.f32 1.442695, %v36_v18 }
 0x141   :  { %109 = vpow2.f32 %v37_v19 }
 0x14b   :  { %v110_v20 = vpop.eup %109 }
 0x14c   :  { %v39_v21 = vsub.f32 1.0, %v110_v20 }
 0x14e   :  { %v40_v22 = vmul.f32 %v39_v21, %v39_v21 }
 0x150   :  { %v41_v23 = vmul.f32 %v40_v22, %v36_v18 }
 0x152   :  { %v50_v24 = vsel %vm48_vm2, %v41_v23, 0.0 }
 0x153   :  { %v52_v27 = vsel %vm51_vm3, %v50_v24, 0.0 }
 0x154   :  { %53 = vadd.xlane.f32.xlu1 %v52_v27 }
 0x158   :  { %67 = vadd.xlane.f32.xlu1 %v66_v28 }
 0x1e1   :  { %v54_v29 = vpop.xlane.xlu1 %53 }
 0x1e2   :  { %v55_v30 = vrot.slane %v54_v29, 4 }
 0x1e4   :  { %v56_v31 = vadd.f32 %v55_v30, %v54_v29 }
 0x1e5   :  { %v68_v32 = vpop.xlane.xlu1 %67 }
 0x1e6   :  { %v57_v33 = vrot.slane %v56_v31, 2  ;;  %v69_v34 = vrot.slane %v68_v32, 4 }
 0x1e8   :  { %v70_v35 = vadd.f32 %v69_v34, %v68_v32  ;;  %v58_v36 = vadd.f32 %v57_v33, %v56_v31 }
 0x1ea   :  { %v71_v37 = vrot.slane %v70_v35, 2  ;;  %v59_v38 = vrot.slane %v58_v36, 1 }
 0x1ec   :  { %v72_v39 = vadd.f32 %v71_v37, %v70_v35  ;;  %v60_v40 = vadd.f32 %v59_v38, %v58_v36 }
 0x1ee   :  { %97 = vpush %v60_v40  ;;  %v73_v41 = vrot.slane %v72_v39, 1 }
 0x1f0   :  { %v74_v42 = vadd.f32 %v73_v41, %v72_v39 }
 0x1f2   :  { %99 = vpush %v74_v42 }
 0x21f   :  { %s98_s0 = spop %97 }
 0x220   :  { %v62_v43 = vstv %s98_s0 }
 0x221   :  { %v63_v44 = vsub.f32 0.0, %v62_v43 }
 0x223   :  { %s100_s14 = spop %99 }
 0x224   :  { %v78_v45 = vstv %s100_s14 }
 0x225   :  { %v79_v46 = vsel %vm77_vm4, %v78_v45, 0.0 }
 0x226   :  { %v80_v47 = vsel %vm76_vm5, %v63_v44, %v79_v46 }
 0x227   :  { %81 = vst [vmem:[#allocation2] sm:$0xff] %v80_v47 }
 0x228   :  { %122 = shalt.err (!%p119_p4)
}
 0x229   :  { %s123_s18 = scalar_lea.hbm %s176_s2, 128 }
 0x22a   :  { %p124_p5 = scmp.ne.s32.totalorder %s176_s2, %s123_s18  ;;  %p127_p6 = scmp.lt.u32.totalorder %s123_s18, %s176_s2 }
 0x22c   :  { %p129_p7 = pnand %p127_p6, %p124_p5 }
 0x22e   :  { %132 = shalt.err (!%p129_p7)
}
 0x22f   :  { %91 = dma.vmem_to_hbm [thread:$0]  %s89_s13, 128, %s176_s2, [#allocation3]  }
 0x230   :  { %133 = dma.done.wait [#allocation3], 128  }
 0x231   :  { %134 = vsyncadd [#allocation3], 4294967168 }
 0x232   :  { %95 = vsyncpa [#allocation3], 1 }

</bundles_post_ra>
